<compile_context>
chip_gen: v5e
topology: v5e:2x2
jax: 0.10.0
libtpu: 0.0.40
codegen_flags: <defaults>
</compile_context>

<pallas_src>
import math

import jax
import jax.numpy as jnp
from jax import lax
from jax.experimental import pallas as pl
from jax.experimental.pallas import tpu as pltpu

LANE = 128
SUBLANE = 8


def _round_up(x, m):
    return ((x + m - 1) // m) * m


# ---------------------------------------------------------------------------
# Fused multi-layer "same" conv2d chain (stride=1, dilation=1, no bias)
# ---------------------------------------------------------------------------
def _make_fused_kernel(num_layers, cin_pads, offsets, marg, sp, cmax):
    """cin_pads[l]: sublane-padded input channels of layer l.
    offsets: tap offsets d=(kh-pad)*Wp+(kw-pad) in the flattened padded frame
    (same (kh,kw,c) order the weights were packed with).  marg: lane-aligned
    halo margin (>= max|d|).  sp: flattened padded spatial size (128-multiple)."""

    def kernel(*refs):
        x_ref, mask_ref = refs[0], refs[1]
        w_refs = refs[2:2 + num_layers]
        o_ref = refs[2 + num_layers]
        src = refs[3 + num_layers]            # VMEM scratch (cmax, marg+sp+marg)

        # Halo margins feed only border outputs (masked below) but must hold
        # finite values -> zero just the margins, never the whole buffer.
        src[:, :marg] = jnp.zeros((cmax, marg), jnp.float32)
        src[:, marg + sp:] = jnp.zeros((cmax, marg), jnp.float32)

        mask = mask_ref[...]                  # (1, sp) 0/1 interior mask
        act = x_ref[...]                      # (cin_pads[0], sp) padded image

        for l, w_ref in enumerate(w_refs):
            cinp = cin_pads[l]
            # Stage current activation at the lane-aligned interior of the scratch.
            src[:cinp, marg:marg + sp] = act
            # KH*KW statically shifted window loads (lane rotates on the XLU),
            # stacked along sublanes (aligned, cinp is a multiple of 8) so the
            # whole layer is ONE K-packed MXU matmul.
            stacked = jnp.concatenate(
                [src[:cinp, marg + d:marg + d + sp] for d in offsets], axis=0)
            act = jnp.dot(w_ref[...], stacked,
                          preferred_element_type=jnp.float32)
            # Zero the 1-px border + lane tail: `act` is now directly the next
            # layer's zero-padded input (and the final store is deterministic).
            act = act * mask

        o_ref[...] = act.astype(o_ref.dtype)

    return kernel


def multiconv2d_pallas(x_packed, mask, weights_packed, offsets, cin_pads):
    """x_packed: (N, Cin_pad0, Sp) zero-padded flattened images.
    Returns (N, Cout_pad, Sp); conv-chain result sits at interior positions."""
    n, c0p, sp = x_packed.shape
    num_layers = len(weights_packed)
    coutp = weights_packed[-1].shape[0]
    cmax = max(cin_pads)

    dmax = max(abs(d) for d in offsets)
    marg = _round_up(max(dmax, 1), LANE)

    kernel = _make_fused_kernel(num_layers, cin_pads, offsets, marg, sp, cmax)

    in_specs = [
        pl.BlockSpec((None, c0p, sp), lambda i: (i, 0, 0)),   # one image / step
        pl.BlockSpec((1, sp), lambda i: (0, 0)),              # interior mask
    ]
    # Weights: tiny (Cout_pad, 9*Cin_pad) tiles, constant index_map -> VMEM-resident
    # across all grid steps (double-buffering them costs only a few KiB now).
    in_specs += [pl.BlockSpec(w.shape, lambda i: (0, 0)) for w in weights_packed]

    grid_spec = pltpu.PrefetchScalarGridSpec(
        num_scalar_prefetch=0,
        grid=(n,),
        in_specs=in_specs,
        out_specs=pl.BlockSpec((None, coutp, sp), lambda i: (i, 0, 0)),
        scratch_shapes=[pltpu.VMEM((cmax, sp + 2 * marg), jnp.float32)],
    )

    return pl.pallas_call(
        kernel,
        out_shape=jax.ShapeDtypeStruct((n, coutp, sp), x_packed.dtype),
        grid_spec=grid_spec,
        compiler_params=pltpu.CompilerParams(
            dimension_semantics=("parallel",),   # batch axis -> v7x megacore
        ),
    )(x_packed, mask, *weights_packed)


# ---------------------------------------------------------------------------
# Plain-JAX glue: parameter init (ZeroMean parametrization + spectral-norm init)
# ---------------------------------------------------------------------------
def _zero_mean(w_oihw):
    # ZeroMean parametrization: subtract per-output-channel mean over (Cin,KH,KW)
    return w_oihw - jnp.mean(w_oihw, axis=(1, 2, 3), keepdims=True)


def _normalize(t, eps=1e-12):
    n = jnp.sqrt(jnp.sum(t ** 2))
    return t / jnp.maximum(n, eps)


def _conv_ref(x_nchw, w_oihw, padding):
    return lax.conv_general_dilated(
        x_nchw, w_oihw, window_strides=(1, 1),
        padding=[(padding, padding), (padding, padding)],
        dimension_numbers=("NCHW", "OIHW", "NCHW"))


def _conv_transpose_ref(x_nchw, w_oihw, padding, kernel_size):
    # conv_transpose2d(x, W, padding=p, stride=1)
    #   == conv2d(x, flip_hw(W) with I/O channels swapped, padding=k-1-p)
    wt = jnp.transpose(jnp.flip(w_oihw, axis=(2, 3)), (1, 0, 2, 3))
    p = kernel_size - 1 - padding
    return lax.conv_general_dilated(
        x_nchw, wt, window_strides=(1, 1), padding=[(p, p), (p, p)],
        dimension_numbers=("NCHW", "OIHW", "NCHW"))


class MultiConv2dPallas:
    """JAX/Pallas port of MultiConv2d (forward = chained zero-mean convs)."""

    def __init__(self, channels, kernel_size=3, padding=1, key=None):
        self.channels = list(channels)
        self.kernel_size = kernel_size
        self.padding = padding
        if key is None:
            key = jax.random.PRNGKey(0)

        # Deterministic Conv2d-style init (kaiming_uniform(a=sqrt(5)) bound).
        raw = []
        for i in range(len(channels) - 1):
            key, sub = jax.random.split(key)
            fan_in = channels[i] * kernel_size * kernel_size
            bound = 1.0 / math.sqrt(fan_in)
            w = jax.random.uniform(
                sub, (channels[i + 1], channels[i], kernel_size, kernel_size),
                dtype=jnp.float32, minval=-bound, maxval=bound)
            raw.append(w)

        # Effective weights seen by forward() = ZeroMean(raw).
        weights = [_zero_mean(w) for w in raw]

        # initSN(): rescale so the initial spectral norm of the composed operator
        # is 1 (init-time only; forward semantics stay "chain of zero-mean convs").
        key, sub = jax.random.split(key)
        sn = self._spectral_norm(weights, sub, n_power_iterations=10, size=40)
        scale = sn ** (1.0 / len(weights))
        self.weights_oihw = [w / scale for w in weights]

        # --- pack weights ONCE for the fused kernel ------------------------
        # layout (Cout_pad8, KH*KW*Cin_pad8); column = (kh*KW + kw)*Cin_pad + c.
        self.cin_pads = [_round_up(c, SUBLANE) for c in self.channels[:-1]]
        packed = []
        for w in self.weights_oihw:
            cout, cin, kh, kw = w.shape
            coutp = _round_up(cout, SUBLANE)
            cinp = _round_up(cin, SUBLANE)
            wpad = jnp.pad(w, ((0, coutp - cout), (0, cinp - cin), (0, 0), (0, 0)))
            wpad = jnp.transpose(wpad, (0, 2, 3, 1)).reshape(coutp, kh * kw * cinp)
            packed.append(wpad)
        self.weights_packed = packed

    # --- init-time helpers (plain JAX, not the forward hot path) ---
    def _conv_chain(self, x, weights):
        for w in weights:
            x = _conv_ref(x, w, self.padding)
        return x

    def _transpose_chain(self, x, weights):
        for w in reversed(weights):
            x = _conv_transpose_ref(x, w, self.padding, self.kernel_size)
        return x

    def _spectral_norm(self, weights, key, n_power_iterations=10, size=40):
        u = jax.random.normal(key, (1, self.channels[0], size, size), jnp.float32)
        v = u
        for _ in range(n_power_iterations):
            v = _normalize(self._conv_chain(u, weights))
            u = _normalize(self._transpose_chain(v, weights))
        return jnp.sum(u * self._transpose_chain(v, weights))

    # --- forward: fused Pallas hot path ---
    def forward(self, x_nchw):
        n, c, h, w = x_nchw.shape
        pad, k = self.padding, self.kernel_size
        assert c == self.channels[0]
        # TODO(synk): the fused kernel only implements the standard "same"
        # configuration (odd kernel, padding == kernel_size // 2); other
        # paddings change per-layer spatial sizes and are not fused here.
        assert k == 2 * pad + 1, "fused kernel requires padding == kernel_size // 2"

        hp, wp = h + 2 * pad, w + 2 * pad
        s = hp * wp
        sp = _round_up(s, LANE)
        c0p = self.cin_pads[0]

        # Stage input once (tiny): zero-pad spatially, channel-pad to a sublane
        # multiple, flatten (y,x) onto lanes, tail-pad to a 128-lane multiple.
        xp = jnp.pad(x_nchw, ((0, 0), (0, c0p - c), (pad, pad), (pad, pad)))
        xf = jnp.pad(xp.reshape(n, c0p, s), ((0, 0), (0, 0), (0, sp - s)))

        # 0/1 interior mask over the flattened padded frame (border + tail = 0).
        yy = jnp.arange(hp)[:, None]
        xx = jnp.arange(wp)[None, :]
        m = ((yy >= pad) & (yy < pad + h) & (xx >= pad) & (xx < pad + w))
        mask = jnp.pad(m.astype(jnp.float32).reshape(1, s),
                       ((0, 0), (0, sp - s)))

        # Kernel-centre-relative tap offsets, matching the weight packing order.
        offsets = tuple((kh - pad) * wp + (kw - pad)
                        for kh in range(k) for kw in range(k))

        y = multiconv2d_pallas(xf, mask, self.weights_packed, offsets,
                               self.cin_pads)                  # (N, CoutP, Sp)
        cout = self.channels[-1]
        y = y[:, :cout, :s].reshape(n, cout, hp, wp)
        return y[:, :, pad:pad + h, pad:pad + w]               # NCHW

    # pure-JAX reference of the same forward, for verification
    def forward_ref(self, x_nchw):
        return self._conv_chain(x_nchw, self.weights_oihw)


# ---------------------------------------------------------------------------
if __name__ == "__main__":
    key = jax.random.PRNGKey(0)
    key_x, key_w = jax.random.split(key)

    channels = [4, 8, 16]          # 2 conv layers: 4 -> 8 -> 16 channels
    model = MultiConv2dPallas(channels, kernel_size=3, padding=1, key=key_w)

    x = jax.random.normal(key_x, (2, 4, 16, 16), dtype=jnp.float32)  # NCHW

    out = jax.block_until_ready(model.forward(x))
    ref = jax.block_until_ready(model.forward_ref(x))

    assert out.shape == (2, 16, 16, 16), out.shape
    max_err = float(jnp.max(jnp.abs(out - ref)))
    assert jnp.allclose(out, ref, atol=1e-4, rtol=1e-4), max_err

    print("KERNEL_OK")
</pallas_src>

<mosaic_0001>
module attributes {stable_mosaic.version = 11 : i64} {
  func.func @kernel(%arg0: i32, %arg1: memref<1x8x384xf32, #tpu.memory_space<vmem>>, %arg2: memref<1x384xf32, #tpu.memory_space<vmem>>, %arg3: memref<8x72xf32, #tpu.memory_space<vmem>>, %arg4: memref<16x72xf32, #tpu.memory_space<vmem>>, %arg5: memref<1x16x384xf32, #tpu.memory_space<vmem>>, %arg6: memref<8x640xf32, #tpu.memory_space<vmem>>) attributes {dimension_semantics = [#tpu.dimension_semantics<parallel>], iteration_bounds = array<i64: 2>, scalar_prefetch = 0 : i64, scratch_operands = 1 : i64, tpu.core_type = #tpu.core_type<tc>, window_params = [{transform_indices = @transform_0, window_bounds = array<i64: 1, 8, 384>}, {pipeline_mode = #tpu.pipeline_mode<synchronous>, transform_indices = @transform_1, window_bounds = array<i64: 1, 384>}, {pipeline_mode = #tpu.pipeline_mode<synchronous>, transform_indices = @transform_2, window_bounds = array<i64: 8, 72>}, {pipeline_mode = #tpu.pipeline_mode<synchronous>, transform_indices = @transform_3, window_bounds = array<i64: 16, 72>}, {transform_indices = @transform_4, window_bounds = array<i64: 1, 16, 384>}]} {
    %cst = arith.constant 0.000000e+00 : f32
    %0 = vector.broadcast %cst : f32 to vector<8x128xf32>
    %c0 = arith.constant 0 : index
    %c0_0 = arith.constant 0 : index
    %1 = vector.load %arg6[%c0, %c0_0] : memref<8x640xf32, #tpu.memory_space<vmem>>, vector<8x128xf32>
    tpu.vector_store %arg6[%c0, %c0_0], %0 {strides = array<i32>} : memref<8x640xf32, #tpu.memory_space<vmem>>, vector<8x128xf32>,
    %cst_1 = arith.constant 0.000000e+00 : f32
    %2 = vector.broadcast %cst_1 : f32 to vector<8x128xf32>
    %c0_2 = arith.constant 0 : index
    %c512 = arith.constant 512 : index
    %3 = vector.load %arg6[%c0_2, %c512] : memref<8x640xf32, #tpu.memory_space<vmem>>, vector<8x128xf32>
    tpu.vector_store %arg6[%c0_2, %c512], %2 {strides = array<i32>} : memref<8x640xf32, #tpu.memory_space<vmem>>, vector<8x128xf32>,
    %c0_3 = arith.constant 0 : index
    %c0_4 = arith.constant 0 : index
    %4 = vector.load %arg2[%c0_3, %c0_4] : memref<1x384xf32, #tpu.memory_space<vmem>>, vector<1x384xf32>
    %c0_5 = arith.constant 0 : index
    %c0_6 = arith.constant 0 : index
    %c0_7 = arith.constant 0 : index
    %5 = vector.load %arg1[%c0_5, %c0_6, %c0_7] : memref<1x8x384xf32, #tpu.memory_space<vmem>>, vector<1x8x384xf32>
    %6 = vector.shape_cast %5 : vector<1x8x384xf32> to vector<8x384xf32>
    %c0_8 = arith.constant 0 : index
    %c128 = arith.constant 128 : index
    %7 = vector.load %arg6[%c0_8, %c128] : memref<8x640xf32, #tpu.memory_space<vmem>>, vector<8x384xf32>
    tpu.vector_store %arg6[%c0_8, %c128], %6 {strides = array<i32>} : memref<8x640xf32, #tpu.memory_space<vmem>>, vector<8x384xf32>,
    %c0_9 = arith.constant 0 : index
    %c109 = arith.constant 109 : index
    %8 = vector.load %arg6[%c0_9, %c109] : memref<8x640xf32, #tpu.memory_space<vmem>>, vector<8x384xf32>
    %c0_10 = arith.constant 0 : index
    %c110 = arith.constant 110 : index
    %9 = vector.load %arg6[%c0_10, %c110] : memref<8x640xf32, #tpu.memory_space<vmem>>, vector<8x384xf32>
    %c0_11 = arith.constant 0 : index
    %c111 = arith.constant 111 : index
    %10 = vector.load %arg6[%c0_11, %c111] : memref<8x640xf32, #tpu.memory_space<vmem>>, vector<8x384xf32>
    %c0_12 = arith.constant 0 : index
    %c127 = arith.constant 127 : index
    %11 = vector.load %arg6[%c0_12, %c127] : memref<8x640xf32, #tpu.memory_space<vmem>>, vector<8x384xf32>
    %c0_13 = arith.constant 0 : index
    %c128_14 = arith.constant 128 : index
    %12 = vector.load %arg6[%c0_13, %c128_14] : memref<8x640xf32, #tpu.memory_space<vmem>>, vector<8x384xf32>
    %c0_15 = arith.constant 0 : index
    %c129 = arith.constant 129 : index
    %13 = vector.load %arg6[%c0_15, %c129] : memref<8x640xf32, #tpu.memory_space<vmem>>, vector<8x384xf32>
    %c0_16 = arith.constant 0 : index
    %c145 = arith.constant 145 : index
    %14 = vector.load %arg6[%c0_16, %c145] : memref<8x640xf32, #tpu.memory_space<vmem>>, vector<8x384xf32>
    %c0_17 = arith.constant 0 : index
    %c146 = arith.constant 146 : index
    %15 = vector.load %arg6[%c0_17, %c146] : memref<8x640xf32, #tpu.memory_space<vmem>>, vector<8x384xf32>
    %c0_18 = arith.constant 0 : index
    %c147 = arith.constant 147 : index
    %16 = vector.load %arg6[%c0_18, %c147] : memref<8x640xf32, #tpu.memory_space<vmem>>, vector<8x384xf32>
    %17 = tpu.concatenate %8, %9, %10, %11, %12, %13, %14, %15, %16 in 0 : vector<8x384xf32>, vector<8x384xf32>, vector<8x384xf32>, vector<8x384xf32>, vector<8x384xf32>, vector<8x384xf32>, vector<8x384xf32>, vector<8x384xf32>, vector<8x384xf32> -> vector<72x384xf32>
    %c0_19 = arith.constant 0 : index
    %c0_20 = arith.constant 0 : index
    %18 = vector.load %arg3[%c0_19, %c0_20] : memref<8x72xf32, #tpu.memory_space<vmem>>, vector<8x72xf32>
    %cst_21 = arith.constant dense<0.000000e+00> : vector<8x384xf32>
    %19 = tpu.matmul %18, %17, %cst_21 {dimension_numbers = #tpu.dot_dimension_numbers<[1], [0], [0], [1], [0, 0, 1, 1], [], []>} : vector<8x72xf32>, vector<72x384xf32>, vector<8x384xf32> -> vector<8x384xf32>
    %20 = vector.broadcast %4 : vector<1x384xf32> to vector<8x384xf32>
    %21 = arith.mulf %19, %20 : vector<8x384xf32>
    %c0_22 = arith.constant 0 : index
    %c128_23 = arith.constant 128 : index
    %22 = vector.load %arg6[%c0_22, %c128_23] : memref<8x640xf32, #tpu.memory_space<vmem>>, vector<8x384xf32>
    tpu.vector_store %arg6[%c0_22, %c128_23], %21 {strides = array<i32>} : memref<8x640xf32, #tpu.memory_space<vmem>>, vector<8x384xf32>,
    %c0_24 = arith.constant 0 : index
    %c109_25 = arith.constant 109 : index
    %23 = vector.load %arg6[%c0_24, %c109_25] : memref<8x640xf32, #tpu.memory_space<vmem>>, vector<8x384xf32>
    %c0_26 = arith.constant 0 : index
    %c110_27 = arith.constant 110 : index
    %24 = vector.load %arg6[%c0_26, %c110_27] : memref<8x640xf32, #tpu.memory_space<vmem>>, vector<8x384xf32>
    %c0_28 = arith.constant 0 : index
    %c111_29 = arith.constant 111 : index
    %25 = vector.load %arg6[%c0_28, %c111_29] : memref<8x640xf32, #tpu.memory_space<vmem>>, vector<8x384xf32>
    %c0_30 = arith.constant 0 : index
    %c127_31 = arith.constant 127 : index
    %26 = vector.load %arg6[%c0_30, %c127_31] : memref<8x640xf32, #tpu.memory_space<vmem>>, vector<8x384xf32>
    %c0_32 = arith.constant 0 : index
    %c128_33 = arith.constant 128 : index
    %27 = vector.load %arg6[%c0_32, %c128_33] : memref<8x640xf32, #tpu.memory_space<vmem>>, vector<8x384xf32>
    %c0_34 = arith.constant 0 : index
    %c129_35 = arith.constant 129 : index
    %28 = vector.load %arg6[%c0_34, %c129_35] : memref<8x640xf32, #tpu.memory_space<vmem>>, vector<8x384xf32>
    %c0_36 = arith.constant 0 : index
    %c145_37 = arith.constant 145 : index
    %29 = vector.load %arg6[%c0_36, %c145_37] : memref<8x640xf32, #tpu.memory_space<vmem>>, vector<8x384xf32>
    %c0_38 = arith.constant 0 : index
    %c146_39 = arith.constant 146 : index
    %30 = vector.load %arg6[%c0_38, %c146_39] : memref<8x640xf32, #tpu.memory_space<vmem>>, vector<8x384xf32>
    %c0_40 = arith.constant 0 : index
    %c147_41 = arith.constant 147 : index
    %31 = vector.load %arg6[%c0_40, %c147_41] : memref<8x640xf32, #tpu.memory_space<vmem>>, vector<8x384xf32>
    %32 = tpu.concatenate %23, %24, %25, %26, %27, %28, %29, %30, %31 in 0 : vector<8x384xf32>, vector<8x384xf32>, vector<8x384xf32>, vector<8x384xf32>, vector<8x384xf32>, vector<8x384xf32>, vector<8x384xf32>, vector<8x384xf32>, vector<8x384xf32> -> vector<72x384xf32>
    %c0_42 = arith.constant 0 : index
    %c0_43 = arith.constant 0 : index
    %33 = vector.load %arg4[%c0_42, %c0_43] : memref<16x72xf32, #tpu.memory_space<vmem>>, vector<16x72xf32>
    %cst_44 = arith.constant dense<0.000000e+00> : vector<16x384xf32>
    %34 = tpu.matmul %33, %32, %cst_44 {dimension_numbers = #tpu.dot_dimension_numbers<[1], [0], [0], [1], [0, 0, 1, 1], [], []>} : vector<16x72xf32>, vector<72x384xf32>, vector<16x384xf32> -> vector<16x384xf32>
    %35 = vector.broadcast %4 : vector<1x384xf32> to vector<16x384xf32>
    %36 = arith.mulf %34, %35 : vector<16x384xf32>
    %c0_45 = arith.constant 0 : index
    %c0_46 = arith.constant 0 : index
    %c0_47 = arith.constant 0 : index
    %37 = vector.load %arg5[%c0_45, %c0_46, %c0_47] : memref<1x16x384xf32, #tpu.memory_space<vmem>>, vector<1x16x384xf32>
    %38 = vector.shape_cast %37 : vector<1x16x384xf32> to vector<16x384xf32>
    %39 = vector.shape_cast %36 : vector<16x384xf32> to vector<1x16x384xf32>
    tpu.vector_store %arg5[%c0_45, %c0_46, %c0_47], %39 {strides = array<i32>} : memref<1x16x384xf32, #tpu.memory_space<vmem>>, vector<1x16x384xf32>,
    return
  }
  func.func @transform_0(%arg0: i32) -> (i32, i32, i32) {
    %c0_i32 = arith.constant 0 : i32
    %c0_i32_0 = arith.constant 0 : i32
    %c0_i32_1 = arith.constant 0 : i32
    return %arg0, %c0_i32, %c0_i32_0 : i32, i32, i32
  }
  func.func @transform_1(%arg0: i32) -> (i32, i32) {
    %c0_i32 = arith.constant 0 : i32
    %c0_i32_0 = arith.constant 0 : i32
    %c0_i32_1 = arith.constant 0 : i32
    return %c0_i32, %c0_i32_0 : i32, i32
  }
  func.func @transform_2(%arg0: i32) -> (i32, i32) {
    %c0_i32 = arith.constant 0 : i32
    %c0_i32_0 = arith.constant 0 : i32
    %c0_i32_1 = arith.constant 0 : i32
    return %c0_i32, %c0_i32_0 : i32, i32
  }
  func.func @transform_3(%arg0: i32) -> (i32, i32) {
    %c0_i32 = arith.constant 0 : i32
    %c0_i32_0 = arith.constant 0 : i32
    %c0_i32_1 = arith.constant 0 : i32
    return %c0_i32, %c0_i32_0 : i32, i32
  }
  func.func @transform_4(%arg0: i32) -> (i32, i32, i32) {
    %c0_i32 = arith.constant 0 : i32
    %c0_i32_0 = arith.constant 0 : i32
    %c0_i32_1 = arith.constant 0 : i32
    return %arg0, %c0_i32, %c0_i32_0 : i32, i32, i32
  }
}

</mosaic_0001>

<bundles_post_ra>
// kernel: tpu_custom_call.1
= control target key start
LH: loop header
LB: loop body
LE: loop exit
PB: predicated region body
PF: predicated region fallthrough
CT: control target
= control target key end

     0   :  { %9 = vsyncpa [#allocation4], 0  ;;  %s2201_s0 = inlined_call_operand.hbm [shape: f32[2,8,384], index: 0, kind: input, shape index: {}]   ;;  %s2202_s1 = inlined_call_operand.hbm [shape: f32[1,384], index: 1, kind: input, shape index: {}]   ;;  %s2203_s2 = inlined_call_operand.hbm [shape: f32[8,72], index: 2, kind: input, shape index: {}]   ;;  %s2204_s3 = inlined_call_operand.hbm [shape: f32[16,72], index: 3, kind: input, shape index: {}]   ;;  %s2205_s4 = inlined_call_operand.hbm [shape: f32[2,16,384], index: 4, kind: output, shape index: {}]  }
   0x1   :  { %11 = vsyncpa [#allocation4 + $0x1], 0 }
   0x2   :  { %12 = vsyncpa [#allocation7], 0 }
   0x3   :  { %13 = vsyncpa [#allocation10], 0 }
   0x4   :  { %14 = vsyncpa [#allocation5], 0 }
   0x5   :  { %16 = vsyncpa [#allocation5 + $0x1], 0  ;;  %s1715_s15 = smov 0   ;;  %s1717_s16 = smov 0  }
   0x6   :  { %s1719_s17 = smov 0   ;;  %s1721_s18 = smov 0  }
   0x7 LB: > { %s1736_s19 = sadd.s32 4294967295, %s1671_s18   ;;  %s1019_s20 = sadd.s32 4294967294, %s1671_s18   ;;  %s1671_s18 = sphi %s1721_s18, %s2216_s18   ;;  %s1667_s17 = sphi %s1719_s17, %s2215_s17   ;;  %s1663_s16 = sphi %s1717_s16, %s2214_s16   ;;  %s1659_s15 = sphi %s1715_s15, %s2213_s15  }
   0x8   : > { %p42_p0 = scmp.ne.s32.totalorder %s1663_s16, %s1659_s15  ;;  %p43_p1 = scmp.eq.s32.totalorder %s1736_s19, 0 }
   0x9   : > { %p129_p2 = scmp.eq.s32.totalorder %s1736_s19, 1  ;;  %p135_p3 = scmp.eq.s32.totalorder %s1019_s20, 1 }
   0xa   : > { %p1745_p4 = por %p43_p1, %p42_p0  ;;  %p1020_p5 = scmp.ge.s32.totalorder %s1671_s18, 1 }
   0xb   : > { %p1750_p6 = por %p135_p3, %p42_p0  ;;  %p142_p7 = scmp.lt.s32.totalorder %s1671_s18, 3 }
   0xc   : > { %s154_s25 = sshll.u32 %s2202_s1, 4  ;;  %s1673_s27 = smov [#allocation6]   ;;  %s155_s25 = int_to_ptr.hbm [resolvable:$true] %s154_s25 }
   0xd   : > { %p1758_p8 = pnand %p1020_p5, %p142_p7  ;;  %s156_s28 = sshll.u32 %s1673_s27, 4  ;;  %s157_s28 = int_to_ptr.vmem [resolvable:$true] %s156_s28 }
   0xe   : > { %s166_s5 = sshll.u32 %s2203_s2, 4  ;;  %s177_s9 = sshll.u32 %s2204_s3, 4  ;;  %s167_s5 = int_to_ptr.hbm [resolvable:$true] %s166_s5  ;;  %s178_s9 = int_to_ptr.hbm [resolvable:$true] %s177_s9 }
   0xf   : > { %p1072_p10 = pneg %p1758_p8  ;;  %s1674_s10 = smov [#allocation8]  }
  0x10   : > { %s168_s11 = sshll.u32 %s1674_s10, 4  ;;  %s1675_s12 = smov [#allocation9]   ;;  %s169_s11 = int_to_ptr.vmem [resolvable:$true] %s168_s11 }
  0x11   : > { %p1770_p11 = pnand %p1072_p10, %p43_p1  ;;  %s179_s13 = sshll.u32 %s1675_s12, 4  ;;  %s180_s13 = int_to_ptr.vmem [resolvable:$true] %s179_s13 }
  0x12   : > { %s1676_s14 = smov 128   ;;  %s1677_s20 = smov 8  }
  0x13   : > { %1075 = dma.hbm_to_vmem [thread:$0]  (!%p1770_p11), %s155_s25, 48, %s157_s28, [#allocation7]  }
  0x14   : > { %1078 = dma.hbm_to_vmem [thread:$0]  (!%p1770_p11), %s167_s5, 128, %s169_s11, [#allocation7]  }
  0x15   : > { %1081 = dma.hbm_to_vmem [thread:$0]  (!%p1770_p11), %s178_s9, 256, %s180_s13, [#allocation10], %s1676_s14, %s1676_s14, %s1677_s20  }
  0x16   : > { %s1784_s23 = sadd.s32 1, %s1671_s18   ;;  %s29_s25 = sadd.s32 1, %s1667_s17 }
  0x17   : > { %s26_s24 = ssub.s32 %s1671_s18, %s1784_s23  ;;  %p36_p13 = scmp.ne.s32.totalorder %s1667_s17, %s1663_s16 }
  0x18   : > { %p27_p12 = scmp.eq.s32.totalorder %s26_s24, 0  ;;  %p37_p0 = scmp.eq.s32.totalorder %s1671_s18, 0 }
  0x19   : > { %p1093_p3 = scmp.lt.s32.totalorder %s1671_s18, 2  ;;  %p1798_p7 = por %p129_p2, %p36_p13 }
  0x1a   : > { %s1794_s27 = scalar_select %p27_p12, %s1667_s17, %s29_s25  }
  0x1b   : > { %p38_p5 = por %p37_p0, %p36_p13  ;;  %s193_s29 = sand.u32 1, %s1667_s17  }
  0x1c   : > { %s1052_s30 = smul.u32 24, %s1671_s18  ;;  %s194_s13 = scalar_lea.sflag [#allocation4], %s193_s29 }
  0x1d   : > { %s1051_s5 = smul.u32 24, %s193_s29  ;;  %p1807_p10 = pnand %p1093_p3, %p38_p5 }
  0x1e   : > { %s202_s8 = scalar_lea.hbm %s2201_s0, %s1052_s30  ;;  %s1574_s30 = scalar_lea.hbm %s2201_s0, 48 }
  0x1f   : > { %s204_s10 = sshll.u32 %s202_s8, 4  ;;  %s197_s11 = scalar_lea.vmem [#allocation3], %s1051_s5  ;;  %s205_s10 = int_to_ptr.hbm [resolvable:$true] %s204_s10 }
  0x20   : > { %s206_s12 = sshll.u32 %s197_s11, 4  ;;  %s1567_s14 = sshra.s32 %s205_s10, 4  ;;  %s207_s12 = int_to_ptr.vmem [resolvable:$true] %s206_s12  ;;  %s1568_s14 = int_to_ptr.hbm [resolvable:$true] %s1567_s14 }
  0x21   : > { %s1569_s20 = scalar_lea.hbm %s1568_s14, 24  ;;  %p1571_p11 = pneg %p1807_p10 }
  0x22   : > { %p1570_p2 = scmp.ne.s32.totalorder %s1568_s14, %s1569_s20  ;;  %p1575_p0 = scmp.lt.s32.totalorder %s1568_s14, %s2201_s0 }
  0x23   : > { %p1576_p3 = scmp.lt.s32.totalorder %s1574_s30, %s1569_s20 }
  0x24   : > { %p1572_p12 = pnand %p1571_p11, %p1570_p2 }
  0x25   : > { %p1577_p5 = por %p1576_p3, %p1575_p0 }
  0x26   : > { %p1573_p13 = pneg %p1572_p12 }
  0x28   : > { %p1578_p9 = pnand %p1577_p5, %p1573_p13 }
  0x2a   : > { %1581 = shalt.err (!%p1578_p9)
}
  0x2b   : > { %1085 = dma.hbm_to_vmem [thread:$0]  (!%p1807_p10), %s205_s10, 384, %s207_s12, %s194_s13  }
  0x2c   : > { %215 = sbr.rel (%p1758_p8) target bundleno = 920 (0x398), region = 36  ;;  %s1824_s29 = sand.u32 (!%p1758_p8), 1, %s1663_s16  }
  0x2d   : > { %s1053_s5 = smul.u32 (!%p1758_p8), 24, %s1824_s29  ;;  %s218_s8 = scalar_lea.sflag (!%p1758_p8), [#allocation4], %s1824_s29 }
  0x2f   : > { %s221_s11 = scalar_lea.vmem (!%p1758_p8), [#allocation3], %s1053_s5 }
  0x31   : > { %1642 = dma.done.wait (%p1745_p4), %s218_s8, 384  }
  0x32   : > { %1644 = vsyncadd (%p1745_p4), %s218_s8, 4294966912 }
  0x33   : > { %1646 = dma.done.wait (%p43_p1), [#allocation7], 176  }
  0x34   : > { %1648 = vsyncadd (%p43_p1), [#allocation7], 4294967120 }
  0x35   : > { %1650 = dma.done.wait (%p43_p1), [#allocation10], 256  }
  0x36   : > { %1652 = vsyncadd (%p43_p1), [#allocation10], 4294967040  ;;  %v265_v0 = vld [vmem:[%s221_s11] sm:$0xff]  ;;  %v266_v1 = vld [vmem:[%s221_s11 + $0x8] sm:$0xff]  ;;  %s1678_s26 = smov 109   ;;  %s1679_s21 = smov 92  }
  0x37   : > { %v1167_v2 = vpack.i.bf16 %v266_v1, %v265_v0  ;;  %s1680_s9 = smov 90   ;;  %v267_v3 = vld [vmem:[%s221_s11 + $0x10] sm:$0xff]  ;;  %s1681_s10 = smov 108   ;;  %v1683_v6 = vmov 0.0   ;;  %vm352_vm0 = vcmask 752640   ;;  %vm376_vm1 = vcmask 736256  }
  0x38   : > { %v1172_v4 = vpack.i.bf16 0.0, %v267_v3  ;;  %s1682_s12 = smov 91   ;;  %v1846_v5 = vpack.i.bf16 %v267_v3, %v266_v1  ;;  %v1177_v7 = vpack.i.bf16 %v265_v0, %v1683_v6  ;;  %s1684_s13 = smov 110   ;;  %vm340_vm2 = vcmask 883712  }
  0x39   : > { %1168 = vrot.lane.b32.xlu2 %v1167_v2, %s1678_s26  ;;  %1158 = vrot.lane.b32.xlu1 %v1167_v2, %s1679_s21  ;;  %s1685_s14 = smov 126   ;;  %s1686_s20 = smov 127   ;;  %vm364_vm3 = vcmask 744448   ;;  %vm325_vm4 = vcmask 891904   ;;  %vm315_vm5 = vcmask 900096   ;;  %vm303_vm6 = vcmask 1031168  }
  0x3a   : > { %1148 = vrot.lane.b32.xlu0 %v1167_v2, %s1680_s9  ;;  %s1687_s24 = smov 19   ;;  %vm291_vm7 = vcmask 1039360   ;;  %vm453_vm8 = vcmask 154624   ;;  %vm508_vm9 = vcmask 588800   ;;  %s1054_s25 = smul.u32 48, %s1824_s29 }
  0x3b   : > { %s1055_s6 = smul.u32 48, %s1736_s19  ;;  %s902_s19 = scalar_lea.sflag [#allocation5], %s1824_s29 }
  0x3c   : > { %s261_s30 = scalar_lea.vmem [#allocation11], %s1054_s25 }
  0x3d   : > { %s913_s8 = scalar_lea.hbm %s2205_s4, %s1055_s6  ;;  %s914_s11 = sshll.u32 %s261_s30, 4  ;;  %s915_s11 = int_to_ptr.vmem [resolvable:$true] %s914_s11 }
  0x41   : > { %1173 = vrot.lane.b32.xlu2 %v1172_v4, %s1680_s9  ;;  %1163 = vrot.lane.b32.xlu1 %v1167_v2, %s1681_s10 }
  0x42   : > { %1153 = vrot.lane.b32.xlu0 %v1167_v2, %s1682_s12 }
  0x49   : > { %1188 = vrot.lane.b32.xlu2 %v1172_v4, %s1682_s12  ;;  %1183 = vrot.lane.b32.xlu1 %v1846_v5, %s1684_s13 }
  0x4a   : > { %1178 = vrot.lane.b32.xlu0 %v1177_v7, %s1684_s13 }
  0x51   : > { %1203 = vrot.lane.b32.xlu2 %v1172_v4, %s1679_s21  ;;  %1198 = vrot.lane.b32.xlu1 %v1846_v5, %s1685_s14 }
  0x52   : > { %1193 = vrot.lane.b32.xlu0 %v1177_v7, %s1685_s14 }
  0x59   : > { %1218 = vrot.lane.b32.xlu2 %v1172_v4, %s1681_s10  ;;  %1213 = vrot.lane.b32.xlu1 %v1846_v5, %s1686_s20 }
  0x5a   : > { %1208 = vrot.lane.b32.xlu0 %v1177_v7, %s1686_s20 }
  0x61   : > { %1223 = vrot.lane.b32.xlu1 %v1177_v7, %s1687_s24 }
  0x62   : > { %323 = vrot.lane.b32.xlu0 %v267_v3, %s1678_s26 }
  0x93   : > { %v1862_v8 = vpop.permute.xlu2 %1168 }
  0x94   : > { %v1171_v36 = vunpack.i.h.bf16 %v1862_v8  ;;  %v1170_v37 = vunpack.i.l.bf16 %v1862_v8 }
  0x96   : > { %v326_v42 = vsel %vm325_vm4, %v1170_v37, %v1171_v36 }
  0x97   : > { %v1247_v47 = vpack.i.bf16 %v326_v42, %v1170_v37 }
  0x9b   : > { %v1174_v9 = vpop.permute.xlu2 %1173 }
  0x9c   : > { %v1176_v19 = vunpack.i.h.bf16 %v1174_v9  ;;  %v1175_v20 = vunpack.i.l.bf16 %v1174_v9 }
  0x9e   : > { %v379_v28 = vsel %vm376_vm1, %v1175_v20, %v1176_v19 }
  0xa3   : > { %v1189_v22 = vpop.permute.xlu2 %1188 }
  0xa4   : > { %v1191_v49 = vunpack.i.h.bf16 %v1189_v22  ;;  %v1190_v50 = vunpack.i.l.bf16 %v1189_v22 }
  0xa6   : > { %v367_v59 = vsel %vm364_vm3, %v1190_v50, %v1191_v49 }
  0xab   : > { %v1864_v10 = vpop.permute.xlu1 %1158  ;;  %v1204_v39 = vpop.permute.xlu2 %1203 }
  0xac   : > { %v1161_v11 = vunpack.i.h.bf16 %v1864_v10  ;;  %v1160_v12 = vunpack.i.l.bf16 %v1864_v10  ;;  %v1149_v13 = vpop.permute.xlu0 %1148  ;;  %v1206_v51 = vunpack.i.h.bf16 %v1204_v39  ;;  %v1205_v52 = vunpack.i.l.bf16 %v1204_v39 }
  0xad   : > { %v1151_v14 = vunpack.i.h.bf16 %v1149_v13  ;;  %v1150_v15 = vunpack.i.l.bf16 %v1149_v13 }
  0xae   : > { %v353_v16 = vsel %vm352_vm0, %v1160_v12, %v1161_v11  ;;  %v354_v61 = vsel %vm352_vm0, %v1161_v11, %v1205_v52  ;;  %v355_v62 = vsel %vm352_vm0, %v1205_v52, %v1206_v51 }
  0xaf   : > { %v1237_v17 = vpack.i.bf16 %v353_v16, %v1160_v12  ;;  %v377_v18 = vsel %vm376_vm1, %v1150_v15, %v1151_v14  ;;  %v378_v27 = vsel %vm376_vm1, %v1151_v14, %v1175_v20  ;;  %v1272_v6 = vpack.i.bf16 %v355_v62, %v354_v61 }
  0xb0   : > { %v1227_v21 = vpack.i.bf16 %v377_v18, %v1150_v15  ;;  %v1252_v34 = vpack.i.bf16 %v379_v28, %v378_v27 }
  0xb1   : > { %1238 = vrot.lane.b32.xlu0 %v1237_v17, %s1687_s24 }
  0xb2   : > { %1228 = vrot.lane.b32.xlu1 %v1227_v21, %s1687_s24 }
  0xb3   : > { %v1874_v23 = vpop.permute.xlu1 %1163  ;;  %v1219_v60 = vpop.permute.xlu2 %1218 }
  0xb4   : > { %v1166_v24 = vunpack.i.h.bf16 %v1874_v23  ;;  %v1165_v25 = vunpack.i.l.bf16 %v1874_v23  ;;  %v1154_v26 = vpop.permute.xlu0 %1153  ;;  %v1221_v3 = vunpack.i.h.bf16 %v1219_v60  ;;  %v1220_v4 = vunpack.i.l.bf16 %v1219_v60 }
  0xb5   : > { %v1156_v29 = vunpack.i.h.bf16 %v1154_v26  ;;  %v1155_v30 = vunpack.i.l.bf16 %v1154_v26 }
  0xb6   : > { %v341_v31 = vsel %vm340_vm2, %v1165_v25, %v1166_v24  ;;  %v342_v14 = vsel %vm340_vm2, %v1166_v24, %v1220_v4  ;;  %v343_v15 = vsel %vm340_vm2, %v1220_v4, %v1221_v3 }
  0xb7   : > { %v1242_v32 = vpack.i.bf16 %v341_v31, %v1165_v25  ;;  %v365_v33 = vsel %vm364_vm3, %v1155_v30, %v1156_v29  ;;  %v366_v58 = vsel %vm364_vm3, %v1156_v29, %v1190_v50  ;;  %v1282_v20 = vpack.i.bf16 %v343_v15, %v342_v14  ;;  %v380_v15 = vld [vmem:[#allocation8] sm:$0xff] }
  0xb8   : > { %v1232_v35 = vpack.i.bf16 %v365_v33, %v1155_v30  ;;  %v1262_v1 = vpack.i.bf16 %v367_v59, %v366_v58 }
  0xb9   : > { %1253 = vrot.lane.b32.xlu0 %v1252_v34, %s1687_s24 }
  0xba   : > { %1233 = vrot.lane.b32.xlu2 %v1232_v35, %s1687_s24  ;;  %1243 = vrot.lane.b32.xlu1 %v1242_v32, %s1687_s24 }
  0xbb   : > { %v1889_v38 = vpop.permute.xlu1 %1183 }
  0xbc   : > { %v1185_v40 = vunpack.i.l.bf16 %v1889_v38  ;;  %v1179_v41 = vpop.permute.xlu0 %1178  ;;  %v1186_v21 = vunpack.i.h.bf16 %v1889_v38 }
  0xbd   : > { %v1181_v43 = vunpack.i.h.bf16 %v1179_v41  ;;  %v1180_v44 = vunpack.i.l.bf16 %v1179_v41 }
  0xbe   : > { %v318_v24 = vsel %vm315_vm5, %v1185_v40, %v1186_v21 }
  0xbf   : > { %v316_v45 = vsel %vm315_vm5, %v1180_v44, %v1181_v43  ;;  %v317_v46 = vsel %vm315_vm5, %v1181_v43, %v1185_v40  ;;  %v1292_v27 = vpack.i.bf16 %v1186_v21, %v318_v24 }
  0xc0   : > { %v1257_v48 = vpack.i.bf16 %v317_v46, %v316_v45 }
  0xc2   : > { %1248 = vrot.lane.b32.xlu2 %v1247_v47, %s1687_s24  ;;  %1258 = vrot.lane.b32.xlu1 %v1257_v48, %s1687_s24 }
  0xc3   : > { %v1199_v53 = vpop.permute.xlu1 %1198 }
  0xc4   : > { %v1200_v54 = vunpack.i.l.bf16 %v1199_v53  ;;  %v1194_v55 = vpop.permute.xlu0 %1193  ;;  %v1201_v7 = vunpack.i.h.bf16 %v1199_v53 }
  0xc5   : > { %v1196_v56 = vunpack.i.h.bf16 %v1194_v55  ;;  %v1195_v57 = vunpack.i.l.bf16 %v1194_v55 }
  0xc6   : > { %v306_v16 = vsel %vm303_vm6, %v1200_v54, %v1201_v7 }
  0xc7   : > { %v304_v63 = vsel %vm303_vm6, %v1195_v57, %v1196_v56  ;;  %v305_v0 = vsel %vm303_vm6, %v1196_v56, %v1200_v54  ;;  %v1297_v22 = vpack.i.bf16 %v1201_v7, %v306_v16 }
  0xc8   : > { %v1267_v2 = vpack.i.bf16 %v305_v0, %v304_v63 }
  0xca   : > { %1263 = vrot.lane.b32.xlu2 %v1262_v1, %s1687_s24  ;;  %1268 = vrot.lane.b32.xlu0 %v1267_v2, %s1687_s24 }
  0xcb   : > { %1273 = vrot.lane.b32.xlu1 %v1272_v6, %s1687_s24  ;;  %v1214_v9 = vpop.permute.xlu1 %1213 }
  0xcc   : > { %v1215_v10 = vunpack.i.l.bf16 %v1214_v9  ;;  %v1209_v11 = vpop.permute.xlu0 %1208  ;;  %v1216_v26 = vunpack.i.h.bf16 %v1214_v9 }
  0xcd   : > { %v1211_v12 = vunpack.i.h.bf16 %v1209_v11  ;;  %v1210_v13 = vunpack.i.l.bf16 %v1209_v11 }
  0xce   : > { %v294_v29 = vsel %vm291_vm7, %v1215_v10, %v1216_v26 }
  0xcf   : > { %v292_v17 = vsel %vm291_vm7, %v1210_v13, %v1211_v12  ;;  %v293_v18 = vsel %vm291_vm7, %v1211_v12, %v1215_v10  ;;  %v1302_v30 = vpack.i.bf16 %v1216_v26, %v294_v29 }
  0xd0   : > { %v1277_v19 = vpack.i.bf16 %v293_v18, %v292_v17 }
  0xd2   : > { %1278 = vrot.lane.b32.xlu2 %v1277_v19, %s1687_s24  ;;  %1283 = vrot.lane.b32.xlu0 %v1282_v20, %s1687_s24 }
  0xd3   : > { %1298 = vrot.lane.b32.xlu1 %v1297_v22, %s1687_s24  ;;  %v1931_v32 = vpop.permute.xlu1 %1223 }
  0xd4   : > { %v324_v23 = vpop.permute.xlu0 %323  ;;  %v1226_v4 = vunpack.i.h.bf16 %v1931_v32  ;;  %v1225_v6 = vunpack.i.l.bf16 %v1931_v32 }
  0xd5   : > { %v327_v25 = vsel %vm325_vm4, %v1171_v36, %v324_v23 }
  0xd6   : > { %v1287_v28 = vpack.i.bf16 %v324_v23, %v327_v25  ;;  %v454_v14 = vsel %vm453_vm8, %v1225_v6, %v1226_v4 }
  0xda   : > { %1288 = vrot.lane.b32.xlu2 %v1287_v28, %s1687_s24  ;;  %1293 = vrot.lane.b32.xlu0 %v1292_v27, %s1687_s24 }
  0xe2   : > { %1308 = vrot.lane.b32.xlu0 %v1846_v5, %s1687_s24  ;;  %1303 = vrot.lane.b32.xlu2 %v1302_v30, %s1687_s24 }
 0x114   : > { %v1234_v31 = vpop.permute.xlu2 %1233 }
 0x115   : > { %v1236_v35 = vunpack.i.h.bf16 %v1234_v31  ;;  %v1235_v36 = vunpack.i.l.bf16 %v1234_v31 }
 0x117   : > { %v475_v42 = vsel %vm453_vm8, %v1235_v36, %v1236_v35 }
 0x11c   : > { %v1933_v8 = vpop.permute.xlu2 %1248 }
 0x11d   : > { %v1251_v48 = vunpack.i.h.bf16 %v1933_v8  ;;  %v1250_v49 = vunpack.i.l.bf16 %v1933_v8 }
 0x11f   : > { %v466_v55 = vsel %vm453_vm8, %v1250_v49, %v1251_v48 }
 0x123   : > { %v1239_v33 = vpop.permute.xlu0 %1238 }
 0x124   : > { %v1229_v34 = vpop.permute.xlu1 %1228  ;;  %v1241_v39 = vunpack.i.h.bf16 %v1239_v33  ;;  %v1240_v40 = vunpack.i.l.bf16 %v1239_v33  ;;  %v1264_v5 = vpop.permute.xlu2 %1263 }
 0x125   : > { %v1231_v37 = vunpack.i.h.bf16 %v1229_v34  ;;  %v1230_v38 = vunpack.i.l.bf16 %v1229_v34  ;;  %v1265_v45 = vunpack.i.l.bf16 %v1264_v5  ;;  %v1266_v12 = vunpack.i.h.bf16 %v1264_v5 }
 0x126   : > { %v472_v44 = vsel %vm453_vm8, %v1240_v40, %v1241_v39 }
 0x127   : > { %v478_v41 = vsel %vm453_vm8, %v1230_v38, %v1231_v37  ;;  %v476_v54 = vsel %vm453_vm8, %v1236_v35, %v1265_v45  ;;  %v477_v22 = vsel %vm453_vm8, %v1265_v45, %v1266_v12 }
 0x128   : > { %519 = vmatpush.msra.mxu2 %v478_v41 }
 0x12a   : > { %520 = vmatpush.msra.mxu2 %v475_v42 }
 0x12b   : > { %v1254_v43 = vpop.permute.xlu0 %1253 }
 0x12c   : > { %v1255_v46 = vunpack.i.l.bf16 %v1254_v43  ;;  %v1244_v47 = vpop.permute.xlu1 %1243  ;;  %521 = vmatpush.msra.mxu2 %v472_v44  ;;  %v1945_v60 = vpop.permute.xlu2 %1278  ;;  %v1256_v10 = vunpack.i.h.bf16 %v1254_v43 }
 0x12d   : > { %v1246_v50 = vunpack.i.h.bf16 %v1244_v47  ;;  %v1245_v51 = vunpack.i.l.bf16 %v1244_v47  ;;  %v1281_v61 = vunpack.i.h.bf16 %v1945_v60  ;;  %v1280_v62 = vunpack.i.l.bf16 %v1945_v60  ;;  %v264_v47 = vld [vmem:[#allocation6] sm:$0x7] }
 0x12e   : > { %v479_v52 = vsel %vm453_vm8, %v1231_v37, %v1255_v46  ;;  %v480_v18 = vsel %vm453_vm8, %v1255_v46, %v1256_v10 }
 0x12f   : > { %v469_v53 = vsel %vm453_vm8, %v1245_v51, %v1246_v50  ;;  %539 = vmatpush.msra.mxu1 %v479_v52  ;;  %v457_v9 = vsel %vm453_vm8, %v1280_v62, %v1281_v61 }
 0x130   : > { %522 = vmatpush.msra.mxu2 %v469_v53 }
 0x131   : > { %540 = vmatpush.msra.mxu1 %v476_v54 }
 0x132   : > { %523 = vmatpush.msra.mxu2 %v466_v55  ;;  %v1988_v55 = vperm.slane %v264_v47, 2 }
 0x134   : > { %v1259_v56 = vpop.permute.xlu1 %1258  ;;  %v1289_v13 = vpop.permute.xlu2 %1288 }
 0x135   : > { %v1261_v57 = vunpack.i.h.bf16 %v1259_v56  ;;  %v1260_v58 = vunpack.i.l.bf16 %v1259_v56  ;;  %v1290_v19 = vunpack.i.l.bf16 %v1289_v13  ;;  %v1291_v24 = vunpack.i.h.bf16 %v1289_v13 }
 0x137   : > { %v463_v59 = vsel %vm453_vm8, %v1260_v58, %v1261_v57  ;;  %v467_v26 = vsel %vm453_vm8, %v1251_v48, %v1290_v19  ;;  %v468_v31 = vsel %vm453_vm8, %v1290_v19, %v1291_v24  ;;  %v1973_v48 = vperm.slane %v264_v47, 0 }
 0x138   : > { %524 = vmatpush.msra.mxu2 %v463_v59 }
 0x13c   : > { %v1269_v63 = vpop.permute.xlu0 %1268  ;;  %v1304_v29 = vpop.permute.xlu2 %1303 }
 0x13d   : > { %v1271_v0 = vunpack.i.h.bf16 %v1269_v63  ;;  %v1270_v1 = vunpack.i.l.bf16 %v1269_v63  ;;  %v1274_v2 = vpop.permute.xlu1 %1273  ;;  %v1306_v35 = vunpack.i.h.bf16 %v1304_v29  ;;  %v1305_v36 = vunpack.i.l.bf16 %v1304_v29 }
 0x13e   : > { %v1275_v3 = vunpack.i.l.bf16 %v1274_v2  ;;  %v1276_v16 = vunpack.i.h.bf16 %v1274_v2 }
 0x13f   : > { %v460_v7 = vsel %vm453_vm8, %v1270_v1, %v1271_v0  ;;  %v458_v41 = vsel %vm453_vm8, %v1281_v61, %v1305_v36  ;;  %v459_v5 = vsel %vm453_vm8, %v1305_v36, %v1306_v35 }
 0x140   : > { %525 = vmatpush.msra.mxu2 %v460_v7  ;;  %v473_v11 = vsel %vm453_vm8, %v1241_v39, %v1275_v3  ;;  %v474_v25 = vsel %vm453_vm8, %v1275_v3, %v1276_v16 }
 0x141   : > { %541 = vmatpush.msra.mxu1 %v473_v11 }
 0x142   : > { %526 = vmatpush.msra.mxu2 %v457_v9 }
 0x144   : > { %v1284_v17 = vpop.permute.xlu0 %1283  ;;  %527 = vmatpush.msra.mxu2 %v454_v14 }
 0x145   : > { %v1285_v20 = vunpack.i.l.bf16 %v1284_v17  ;;  %v1286_v21 = vunpack.i.h.bf16 %v1284_v17  ;;  %1030 = vmatmul.msk.f32.vlgmr.msra.gmra.mxu2 %vm508_vm9, %v380_v15  ;;  %v1299_v27 = vpop.permute.xlu1 %1298 }
 0x146   : > { %559 = vmatpush.msrb.mxu2 %v480_v18  ;;  %v1301_v32 = vunpack.i.h.bf16 %v1299_v27  ;;  %v1300_v8 = vunpack.i.l.bf16 %v1299_v27 }
 0x147   : > { %v470_v23 = vsel %vm453_vm8, %v1246_v50, %v1285_v20  ;;  %v471_v28 = vsel %vm453_vm8, %v1285_v20, %v1286_v21  ;;  %v1975_v50 = vperm.slane %v264_v47, 1 }
 0x148   : > { %560 = vmatpush.msrb.mxu2 %v477_v22  ;;  %542 = vmatpush.msra.mxu1 %v470_v23  ;;  %v461_v39 = vsel %vm453_vm8, %v1271_v0, %v1300_v8  ;;  %v462_v40 = vsel %vm453_vm8, %v1300_v8, %v1301_v32 }
 0x14a   : > { %561 = vmatpush.msrb.mxu2 %v474_v25  ;;  %543 = vmatpush.msra.mxu1 %v467_v26 }
 0x14c   : > { %562 = vmatpush.msrb.mxu2 %v471_v28  ;;  %v1294_v30 = vpop.permute.xlu0 %1293 }
 0x14d   : > { %v1296_v33 = vunpack.i.h.bf16 %v1294_v30  ;;  %v1295_v34 = vunpack.i.l.bf16 %v1294_v30 }
 0x14e   : > { %563 = vmatpush.msrb.mxu2 %v468_v31 }
 0x14f   : > { %v464_v37 = vsel %vm453_vm8, %v1261_v57, %v1295_v34  ;;  %v465_v38 = vsel %vm453_vm8, %v1295_v34, %v1296_v33 }
 0x150   : > { %544 = vmatpush.msra.mxu1 %v464_v37  ;;  %564 = vmatpush.msrb.mxu2 %v465_v38 }
 0x152   : > { %545 = vmatpush.msra.mxu1 %v461_v39  ;;  %565 = vmatpush.msrb.mxu2 %v462_v40 }
 0x154   : > { %v1309_v42 = vpop.permute.xlu0 %1308  ;;  %546 = vmatpush.msra.mxu1 %v458_v41  ;;  %566 = vmatpush.msrb.mxu2 %v459_v5 }
 0x155   : > { %v1311_v43 = vunpack.i.h.bf16 %v1309_v42  ;;  %v1310_v44 = vunpack.i.l.bf16 %v1309_v42 }
 0x157   : > { %v455_v45 = vsel %vm453_vm8, %v1226_v4, %v1310_v44  ;;  %v456_v46 = vsel %vm453_vm8, %v1310_v44, %v1311_v43 }
 0x158   : > { %547 = vmatpush.msra.mxu1 %v455_v45  ;;  %567 = vmatpush.msrb.mxu2 %v456_v46 }
 0x159   : > { %1031 = vmatmul.msk.f32.vlgmr.msra.gmra.mxu1 %vm508_vm9, %v380_v15  ;;  %1032 = vmatmul.msk.f32.vlgmr.msrb.gmra.mxu2 %vm508_vm9, %v380_v15 }
 0x1c8   : > { %v529_v49 = vpop.f32.mrf.mxu2 }
 0x1c9   : > { %v1978_v51 = vmul.f32 %v1973_v48, %v529_v49 }
 0x1d6   : > { %v549_v52 = vpop.f32.mrf.mxu1 }
 0x1d7   : > { %v1981_v53 = vmul.f32 %v1975_v50, %v549_v52 }
 0x1d9   : > { %v1322_v54 = vpack.i.bf16 %v1981_v53, %v1978_v51 }
 0x1db   : > { %1323 = vrot.lane.b32.xlu2 %v1322_v54, %s1679_s21  ;;  %1318 = vrot.lane.b32.xlu0 %v1322_v54, %s1682_s12 }
 0x1dc   : > { %1313 = vrot.lane.b32.xlu1 %v1322_v54, %s1680_s9  ;;  %v569_v56 = vpop.f32.mrf.mxu2 }
 0x1dd   : > { %v1993_v57 = vmul.f32 %v1988_v55, %v569_v56 }
 0x1df   : > { %v1347_v58 = vpack.i.bf16 0.0, %v1993_v57 }
 0x1e3   : > { %1338 = vrot.lane.b32.xlu2 %v1322_v54, %s1684_s13  ;;  %1333 = vrot.lane.b32.xlu0 %v1322_v54, %s1678_s26 }
 0x1e4   : > { %1328 = vrot.lane.b32.xlu1 %v1322_v54, %s1681_s10 }
 0x1eb   : > { %1348 = vrot.lane.b32.xlu2 %v1347_v58, %s1680_s9  ;;  %1358 = vrot.lane.b32.xlu0 %v1347_v58, %s1679_s21 }
 0x1ec   : > { %1343 = vrot.lane.b32.xlu1 %v1322_v54, %s1685_s14 }
 0x1f3   : > { %1363 = vrot.lane.b32.xlu2 %v1347_v58, %s1681_s10  ;;  %1368 = vrot.lane.b32.xlu0 %v1347_v58, %s1684_s13  ;;  %s1617_s13 = scalar_lea.hbm %s2205_s4, 96 }
 0x1f4   : > { %1353 = vrot.lane.b32.xlu1 %v1347_v58, %s1682_s12 }
 0x1fb   : > { %1373 = vrot.lane.b32.xlu2 %v1347_v58, %s1685_s14  ;;  %1378 = vrot.lane.b32.xlu0 %v1322_v54, %s1686_s20 }
 0x1fc   : > { %634 = vrot.lane.b32.xlu1 %v1993_v57, %s1678_s26  ;;  %s916_s26 = sshll.u32 %s913_s8, 4  ;;  %s917_s26 = int_to_ptr.hbm [resolvable:$true] %s916_s26 }
 0x1fd   : > { %s1611_s21 = sshra.s32 %s917_s26, 4  ;;  %s1612_s21 = int_to_ptr.hbm [resolvable:$true] %s1611_s21 }
 0x1fe   : > { %s1613_s9 = scalar_lea.hbm %s1612_s21, 48  ;;  %p1618_p9 = scmp.lt.s32.totalorder %s1612_s21, %s2205_s4 }
 0x1ff   : > { %p1614_p1 = scmp.ne.s32.totalorder %s1612_s21, %s1613_s9  ;;  %p1619_p10 = scmp.lt.s32.totalorder %s1617_s13, %s1613_s9 }
 0x201   : > { %p1615_p4 = pnand %p1614_p1, %p1798_p7  ;;  %p1620_p2 = por %p1619_p10, %p1618_p9 }
 0x203   : > { %p1616_p8 = pneg %p1615_p4 }
 0x204   : > { %1383 = vrot.lane.b32.xlu1 %v1347_v58, %s1686_s20 }
 0x205   : > { %p1621_p11 = pnand %p1620_p2, %p1616_p8 }
 0x235   : > { %v1324_v59 = vpop.permute.xlu2 %1323 }
 0x236   : > { %v1326_v61 = vunpack.i.h.bf16 %v1324_v59  ;;  %v1325_v62 = vunpack.i.l.bf16 %v1324_v59 }
 0x238   : > { %v661_v6 = vsel %vm352_vm0, %v1325_v62, %v1326_v61 }
 0x23d   : > { %v2008_v60 = vpop.permute.xlu2 %1338 }
 0x23e   : > { %v1340_v58 = vunpack.i.l.bf16 %v2008_v60 }
 0x245   : > { %v2010_v63 = vpop.permute.xlu2 %1348 }
 0x246   : > { %v1350_v0 = vunpack.i.l.bf16 %v2010_v63 }
 0x24d   : > { %v1319_v1 = vpop.permute.xlu0 %1318  ;;  %v2020_v16 = vpop.permute.xlu2 %1363 }
 0x24e   : > { %v1314_v2 = vpop.permute.xlu1 %1313  ;;  %v1320_v22 = vunpack.i.l.bf16 %v1319_v1  ;;  %v1321_v30 = vunpack.i.h.bf16 %v1319_v1  ;;  %v1365_v5 = vunpack.i.l.bf16 %v2020_v16 }
 0x24f   : > { %v1316_v3 = vunpack.i.h.bf16 %v1314_v2  ;;  %v1315_v4 = vunpack.i.l.bf16 %v1314_v2 }
 0x250   : > { %v672_v34 = vsel %vm364_vm3, %v1320_v22, %v1321_v30 }
 0x251   : > { %v1387_v7 = vpack.i.bf16 %v661_v6, %v1315_v4  ;;  %v683_v9 = vsel %vm376_vm1, %v1315_v4, %v1316_v3  ;;  %v684_v10 = vsel %vm376_vm1, %v1316_v3, %v1350_v0 }
 0x252   : > { %v1407_v11 = vpack.i.bf16 %v684_v10, %v683_v9 }
 0x253   : > { %1388 = vrot.lane.b32.xlu1 %v1387_v7, %s1687_s24 }
 0x254   : > { %1408 = vrot.lane.b32.xlu2 %v1407_v11, %s1687_s24 }
 0x255   : > { %v1334_v12 = vpop.permute.xlu0 %1333  ;;  %v2026_v28 = vpop.permute.xlu2 %1373 }
 0x256   : > { %v1336_v13 = vunpack.i.h.bf16 %v1334_v12  ;;  %v1335_v14 = vunpack.i.l.bf16 %v1334_v12  ;;  %v1329_v15 = vpop.permute.xlu1 %1328  ;;  %v1376_v31 = vunpack.i.h.bf16 %v2026_v28 }
 0x257   : > { %v1331_v36 = vunpack.i.h.bf16 %v1329_v15  ;;  %v1330_v37 = vunpack.i.l.bf16 %v1329_v15 }
 0x258   : > { %v636_v17 = vsel %vm325_vm4, %v1335_v14, %v1336_v13 }
 0x259   : > { %v1392_v18 = vpack.i.bf16 %v636_v17, %v1325_v62  ;;  %v650_v44 = vsel %vm340_vm2, %v1330_v37, %v1331_v36  ;;  %v651_v46 = vsel %vm340_vm2, %v1331_v36, %v1365_v5  ;;  %v1375_v62 = vunpack.i.l.bf16 %v2026_v28 }
 0x25a   : > { %v1422_v54 = vpack.i.bf16 %v651_v46, %v650_v44 }
 0x25b   : > { %1393 = vrot.lane.b32.xlu1 %v1392_v18, %s1687_s24 }
 0x25d   : > { %v1359_v19 = vpop.permute.xlu0 %1358 }
 0x25e   : > { %v1360_v20 = vunpack.i.l.bf16 %v1359_v19  ;;  %v1344_v21 = vpop.permute.xlu1 %1343  ;;  %v1361_v40 = vunpack.i.h.bf16 %v1359_v19 }
 0x25f   : > { %v1346_v23 = vunpack.i.h.bf16 %v1344_v21  ;;  %v1345_v24 = vunpack.i.l.bf16 %v1344_v21  ;;  %v1366_v21 = vunpack.i.h.bf16 %v2020_v16 }
 0x260   : > { %v662_v25 = vsel %vm352_vm0, %v1326_v61, %v1360_v20  ;;  %v663_v47 = vsel %vm352_vm0, %v1360_v20, %v1361_v40  ;;  %v1341_v61 = vunpack.i.h.bf16 %v2008_v60  ;;  %v1351_v20 = vunpack.i.h.bf16 %v2010_v63 }
 0x261   : > { %v1417_v26 = vpack.i.bf16 %v1320_v22, %v662_v25  ;;  %v617_v27 = vsel %vm303_vm6, %v1345_v24, %v1346_v23  ;;  %v616_v33 = vsel %vm303_vm6, %v1376_v31, %v1345_v24  ;;  %v618_v4 = vsel %vm303_vm6, %v1346_v23, %v1375_v62 }
 0x262   : > { %v1397_v29 = vpack.i.bf16 %v617_v27, %v1335_v14  ;;  %v1402_v39 = vpack.i.bf16 %v1978_v51, %v616_v33  ;;  %v628_v12 = vsel %vm315_vm5, %v1340_v58, %v1341_v61  ;;  %v652_v22 = vsel %vm340_vm2, %v1365_v5, %v1366_v21  ;;  %v686_v21 = vld [vmem:[#allocation9] sm:$0xff] }
 0x263   : > { %1418 = vrot.lane.b32.xlu2 %v1417_v26, %s1687_s24  ;;  %v685_v23 = vsel %vm376_vm1, %v1350_v0, %v1351_v20 }
 0x264   : > { %1398 = vrot.lane.b32.xlu1 %v1397_v29, %s1687_s24 }
 0x265   : > { %v1369_v42 = vpop.permute.xlu0 %1368 }
 0x266   : > { %v1354_v32 = vpop.permute.xlu1 %1353  ;;  %v1371_v52 = vunpack.i.h.bf16 %v1369_v42  ;;  %v1370_v59 = vunpack.i.l.bf16 %v1369_v42 }
 0x267   : > { %v1355_v8 = vunpack.i.l.bf16 %v1354_v32  ;;  %v1356_v41 = vunpack.i.h.bf16 %v1354_v32 }
 0x268   : > { %v627_v1 = vsel %vm315_vm5, %v1371_v52, %v1340_v58  ;;  %v629_v6 = vsel %vm315_vm5, %v1341_v61, %v1370_v59  ;;  %v1467_v25 = vpack.i.bf16 %v1375_v62, %v1370_v59 }
 0x269   : > { %v673_v35 = vsel %vm364_vm3, %v1321_v30, %v1355_v8  ;;  %v674_v49 = vsel %vm364_vm3, %v1355_v8, %v1356_v41  ;;  %v1437_v9 = vpack.i.bf16 %v627_v1, %v618_v4  ;;  %v1432_v60 = vpack.i.bf16 %v629_v6, %v628_v12 }
 0x26a   : > { %v1412_v38 = vpack.i.bf16 %v673_v35, %v672_v34  ;;  %v1457_v56 = vpack.i.bf16 %v663_v47, %v674_v49 }
 0x26c   : > { %1413 = vrot.lane.b32.xlu0 %v1412_v38, %s1687_s24  ;;  %1403 = vrot.lane.b32.xlu1 %v1402_v39, %s1687_s24 }
 0x26d   : > { %v1379_v7 = vpop.permute.xlu0 %1378 }
 0x26e   : > { %v635_v43 = vpop.permute.xlu1 %634  ;;  %v1381_v14 = vunpack.i.h.bf16 %v1379_v7 }
 0x26f   : > { %v637_v45 = vsel %vm325_vm4, %v1336_v13, %v635_v43  ;;  %v1380_v13 = vunpack.i.l.bf16 %v1379_v7  ;;  %v1462_v24 = vpack.i.bf16 %v635_v43, %v652_v22 }
 0x270   : > { %v1427_v51 = vpack.i.bf16 %v1330_v37, %v637_v45 }
 0x271   : > { %v606_v19 = vsel %vm291_vm7, %v1380_v13, %v1381_v14 }
 0x272   : > { %1428 = vrot.lane.b32.xlu2 %v1427_v51, %s1687_s24 }
 0x274   : > { %1423 = vrot.lane.b32.xlu0 %v1422_v54, %s1687_s24  ;;  %1458 = vrot.lane.b32.xlu1 %v1457_v56, %s1687_s24 }
 0x276   : > { %v1384_v2 = vpop.permute.xlu1 %1383 }
 0x277   : > { %v1385_v3 = vunpack.i.l.bf16 %v1384_v2  ;;  %v1386_v10 = vunpack.i.h.bf16 %v1384_v2 }
 0x279   : > { %v1472_v11 = vpack.i.bf16 %v1993_v57, %v1385_v3  ;;  %v605_v15 = vsel %vm291_vm7, %v1386_v10, %v1380_v13  ;;  %v607_v17 = vsel %vm291_vm7, %v1381_v14, %v1385_v3 }
 0x27a   : > { %1438 = vrot.lane.b32.xlu2 %v1437_v9, %s1687_s24  ;;  %v1442_v18 = vpack.i.bf16 %v605_v15, %v1981_v53  ;;  %v1447_v57 = vpack.i.bf16 %v607_v17, %v606_v19  ;;  %v1452_v53 = vpack.i.bf16 0.0, %v685_v23 }
 0x27c   : > { %1433 = vrot.lane.b32.xlu0 %v1432_v60, %s1687_s24  ;;  %1473 = vrot.lane.b32.xlu1 %v1472_v11, %s1687_s24 }
 0x282   : > { %1443 = vrot.lane.b32.xlu2 %v1442_v18, %s1687_s24 }
 0x284   : > { %1448 = vrot.lane.b32.xlu0 %v1447_v57, %s1687_s24 }
 0x28a   : > { %1463 = vrot.lane.b32.xlu2 %v1462_v24, %s1687_s24 }
 0x28c   : > { %1453 = vrot.lane.b32.xlu0 %v1452_v53, %s1687_s24 }
 0x294   : > { %1468 = vrot.lane.b32.xlu0 %v1467_v25, %s1687_s24 }
 0x2ae   : > { %v2072_v26 = vpop.permute.xlu2 %1408 }
 0x2af   : > { %v1411_v16 = vunpack.i.h.bf16 %v2072_v26  ;;  %v1410_v27 = vunpack.i.l.bf16 %v2072_v26 }
 0x2b1   : > { %v785_v63 = vsel %vm453_vm8, %v1410_v27, %v1411_v16 }
 0x2b2   : > { %850 = vmatpush.msra.mxu0 %v785_v63 }
 0x2bd   : > { %v2080_v30 = vpop.permute.xlu2 %1418 }
 0x2be   : > { %v1421_v32 = vunpack.i.h.bf16 %v2080_v30  ;;  %v1420_v38 = vunpack.i.l.bf16 %v2080_v30 }
 0x2c5   : > { %v1389_v0 = vpop.permute.xlu1 %1388 }
 0x2c6   : > { %v1390_v28 = vunpack.i.l.bf16 %v1389_v0  ;;  %v1391_v33 = vunpack.i.h.bf16 %v1389_v0 }
 0x2c8   : > { %v784_v29 = vsel %vm453_vm8, %v1390_v28, %v1410_v27  ;;  %v779_v42 = vsel %vm453_vm8, %v1391_v33, %v1420_v38 }
 0x2c9   : > { %827 = vmatpush.msra.mxu3 %v784_v29 }
 0x2cc   : > { %v2087_v37 = vpop.permute.xlu2 %1428 }
 0x2cd   : > { %v1394_v31 = vpop.permute.xlu1 %1393  ;;  %v1431_v43 = vunpack.i.h.bf16 %v2087_v37  ;;  %v1430_v51 = vunpack.i.l.bf16 %v2087_v37 }
 0x2ce   : > { %v1395_v34 = vunpack.i.l.bf16 %v1394_v31  ;;  %v1396_v45 = vunpack.i.h.bf16 %v1394_v31  ;;  %v687_v31 = vld [vmem:[#allocation9 + $0x8] sm:$0xff] }
 0x2d0   : > { %v778_v5 = vsel %vm453_vm8, %v1395_v34, %v1391_v33  ;;  %v773_v59 = vsel %vm453_vm8, %v1396_v45, %v1430_v51 }
 0x2d4   : > { %v2108_v56 = vpop.permute.xlu2 %1438 }
 0x2d5   : > { %v1441_v62 = vunpack.i.h.bf16 %v2108_v56  ;;  %v1440_v7 = vunpack.i.l.bf16 %v2108_v56 }
 0x2d6   : > { %v1399_v41 = vpop.permute.xlu1 %1398 }
 0x2d7   : > { %v1400_v46 = vunpack.i.l.bf16 %v1399_v41  ;;  %v1401_v2 = vunpack.i.h.bf16 %v1399_v41 }
 0x2d9   : > { %v772_v58 = vsel %vm453_vm8, %v1400_v46, %v1396_v45  ;;  %v767_v12 = vsel %vm453_vm8, %v1401_v2, %v1440_v7 }
 0x2dc   : > { %v2126_v60 = vpop.permute.xlu2 %1443 }
 0x2dd   : > { %v1446_v14 = vunpack.i.h.bf16 %v2126_v60  ;;  %v1445_v19 = vunpack.i.l.bf16 %v2126_v60 }
 0x2de   : > { %v2083_v8 = vpop.permute.xlu0 %1413  ;;  %v1404_v61 = vpop.permute.xlu1 %1403 }
 0x2df   : > { %v1416_v35 = vunpack.i.h.bf16 %v2083_v8  ;;  %v1415_v36 = vunpack.i.l.bf16 %v2083_v8  ;;  %v1405_v3 = vunpack.i.l.bf16 %v1404_v61  ;;  %v1406_v15 = vunpack.i.h.bf16 %v1404_v61 }
 0x2e1   : > { %v781_v39 = vsel %vm453_vm8, %v1421_v32, %v1415_v36  ;;  %v782_v40 = vsel %vm453_vm8, %v1415_v36, %v1416_v35  ;;  %v766_v11 = vsel %vm453_vm8, %v1405_v3, %v1401_v2  ;;  %v761_v22 = vsel %vm453_vm8, %v1406_v15, %v1445_v19 }
 0x2e2   : > { %828 = vmatpush.msra.mxu3 %v781_v39  ;;  %851 = vmatpush.msra.mxu0 %v782_v40 }
 0x2e4   : > { %829 = vmatpush.msra.mxu3 %v778_v5  ;;  %852 = vmatpush.msra.mxu0 %v779_v42  ;;  %v1464_v29 = vpop.permute.xlu2 %1463 }
 0x2e5   : > { %v1466_v33 = vunpack.i.h.bf16 %v1464_v29  ;;  %v1465_v34 = vunpack.i.l.bf16 %v1464_v29 }
 0x2e6   : > { %v2099_v44 = vpop.permute.xlu0 %1423  ;;  %v1459_v23 = vpop.permute.xlu1 %1458 }
 0x2e7   : > { %v1426_v47 = vunpack.i.h.bf16 %v2099_v44  ;;  %v1425_v49 = vunpack.i.l.bf16 %v2099_v44  ;;  %v1460_v53 = vunpack.i.l.bf16 %v1459_v23  ;;  %v1461_v63 = vunpack.i.h.bf16 %v1459_v23 }
 0x2e8   : > { %v774_v39 = vsel %vm453_vm8, %v1430_v51, %v1466_v33 }
 0x2e9   : > { %v775_v52 = vsel %vm453_vm8, %v1431_v43, %v1425_v49  ;;  %v776_v54 = vsel %vm453_vm8, %v1425_v49, %v1426_v47  ;;  %v783_v32 = vsel %vm453_vm8, %v1416_v35, %v1460_v53  ;;  %v780_v26 = vsel %vm453_vm8, %v1420_v38, %v1461_v63 }
 0x2ea   : > { %830 = vmatpush.msra.mxu3 %v775_v52  ;;  %853 = vmatpush.msra.mxu0 %v776_v54  ;;  %v777_v8 = vsel %vm453_vm8, %v1426_v47, %v1465_v34 }
 0x2ec   : > { %831 = vmatpush.msra.mxu3 %v772_v58  ;;  %854 = vmatpush.msra.mxu0 %v773_v59 }
 0x2ee   : > { %v2115_v1 = vpop.permute.xlu0 %1433  ;;  %v1474_v30 = vpop.permute.xlu1 %1473 }
 0x2ef   : > { %v1436_v4 = vunpack.i.h.bf16 %v2115_v1  ;;  %v1435_v6 = vunpack.i.l.bf16 %v2115_v1  ;;  %v1476_v40 = vunpack.i.h.bf16 %v1474_v30  ;;  %v1475_v41 = vunpack.i.l.bf16 %v1474_v30 }
 0x2f1   : > { %v769_v9 = vsel %vm453_vm8, %v1441_v62, %v1435_v6  ;;  %v770_v10 = vsel %vm453_vm8, %v1435_v6, %v1436_v4  ;;  %v762_v42 = vsel %vm453_vm8, %v1445_v19, %v1476_v40 }
 0x2f2   : > { %832 = vmatpush.msra.mxu3 %v769_v9  ;;  %855 = vmatpush.msra.mxu0 %v770_v10 }
 0x2f4   : > { %833 = vmatpush.msra.mxu3 %v766_v11  ;;  %856 = vmatpush.msra.mxu0 %v767_v12 }
 0x2f6   : > { %v1449_v13 = vpop.permute.xlu0 %1448 }
 0x2f7   : > { %v1451_v17 = vunpack.i.h.bf16 %v1449_v13  ;;  %v1450_v18 = vunpack.i.l.bf16 %v1449_v13 }
 0x2f9   : > { %v763_v57 = vsel %vm453_vm8, %v1446_v14, %v1450_v18  ;;  %v764_v20 = vsel %vm453_vm8, %v1450_v18, %v1451_v17  ;;  %v765_v37 = vsel %vm453_vm8, %v1451_v17, %v1475_v41 }
 0x2fa   : > { %834 = vmatpush.msra.mxu3 %v763_v57  ;;  %857 = vmatpush.msra.mxu0 %v764_v20 }
 0x2fc   : > { %858 = vmatpush.msra.mxu0 %v761_v22 }
 0x2fd   : > { %1035 = vmatmul.msk.f32.vlgmr.msra.gmra.mxu0 %vm508_vm9, %v686_v21 }
 0x2fe   : > { %v1454_v24 = vpop.permute.xlu0 %1453 }
 0x2ff   : > { %v1456_v25 = vunpack.i.h.bf16 %v1454_v24  ;;  %v1455_v27 = vunpack.i.l.bf16 %v1454_v24 }
 0x301   : > { %v760_v0 = vsel %vm453_vm8, %v1456_v25, %v1406_v15  ;;  %v786_v28 = vsel %vm453_vm8, %v1411_v16, %v1455_v27 }
 0x302   : > { %835 = vmatpush.msra.mxu3 %v760_v0  ;;  %873 = vmatpush.msrb.mxu0 %v786_v28 }
 0x303   : > { %1042 = vmatpush.msrb.mxu1 %v786_v28  ;;  %1033 = vmatmul.msk.f32.vlgmr.msra.gmra.mxu3 %vm508_vm9, %v686_v21 }
 0x304   : > { %874 = vmatpush.msrb.mxu0 %v783_v32 }
 0x305   : > { %1043 = vmatpush.msrb.mxu1 %v783_v32  ;;  %1036 = vmatmul.msk.f32.gmra.mxu0 %vm508_vm9, %v687_v31 }
 0x306   : > { %v1469_v16 = vpop.permute.xlu0 %1468  ;;  %875 = vmatpush.msrb.mxu0 %v780_v26 }
 0x307   : > { %v1470_v36 = vunpack.i.l.bf16 %v1469_v16  ;;  %1044 = vmatpush.msrb.mxu1 %v780_v26  ;;  %v1471_v35 = vunpack.i.h.bf16 %v1469_v16 }
 0x308   : > { %876 = vmatpush.msrb.mxu0 %v777_v8 }
 0x309   : > { %1045 = vmatpush.msrb.mxu1 %v777_v8  ;;  %v771_v38 = vsel %vm453_vm8, %v1436_v4, %v1470_v36  ;;  %v768_v5 = vsel %vm453_vm8, %v1440_v7, %v1471_v35 }
 0x30a   : > { %877 = vmatpush.msrb.mxu0 %v774_v39 }
 0x30b   : > { %1046 = vmatpush.msrb.mxu1 %v774_v39  ;;  %1034 = vmatmul.msk.f32.gmra.mxu3 %vm508_vm9, %v687_v31 }
 0x30c   : > { %878 = vmatpush.msrb.mxu0 %v771_v38 }
 0x30d   : > { %1047 = vmatpush.msrb.mxu1 %v771_v38 }
 0x30e   : > { %879 = vmatpush.msrb.mxu0 %v768_v5 }
 0x30f   : > { %1048 = vmatpush.msrb.mxu1 %v768_v5 }
 0x310   : > { %880 = vmatpush.msrb.mxu0 %v765_v37 }
 0x311   : > { %1049 = vmatpush.msrb.mxu1 %v765_v37 }
 0x312   : > { %881 = vmatpush.msrb.mxu0 %v762_v42 }
 0x313   : > { %1050 = vmatpush.msrb.mxu1 %v762_v42  ;;  %1037 = vmatmul.msk.f32.vlgmr.msrb.gmra.mxu0 %vm508_vm9, %v686_v21 }
 0x314   : > { %1038 = vmatmul.msk.f32.vlgmr.msrb.gmra.mxu1 %vm508_vm9, %v687_v31 }
 0x37a   : > { %v860_v43 = vpop.f32.mrf.mxu0 }
 0x37b   : > { %v890_v44 = vmul.f32 %v860_v43, %v1975_v50 }
 0x37d   : > { %896 = vst [vmem:[%s261_s30 + $0x8] sm:$0xff] %v890_v44 }
 0x382   : > { %v863_v45 = vpop.f32.mrf.mxu0 }
 0x383   : > { %v893_v46 = vmul.f32 %v863_v45, %v1975_v50 }
 0x385   : > { %899 = vst [vmem:[%s261_s30 + $0x20] sm:$0xff] %v893_v46 }
 0x386   : > { %v837_v47 = vpop.f32.mrf.mxu3 }
 0x387   : > { %v889_v49 = vmul.f32 %v837_v47, %v1973_v48 }
 0x389   : > { %895 = vst [vmem:[%s261_s30] sm:$0xff] %v889_v49 }
 0x38e   : > { %v840_v51 = vpop.f32.mrf.mxu3 }
 0x38f   : > { %v892_v52 = vmul.f32 %v840_v51, %v1973_v48 }
 0x390   : > { %v883_v54 = vpop.f32.mrf.mxu0 }
 0x391   : > { %898 = vst [vmem:[%s261_s30 + $0x18] sm:$0xff] %v892_v52  ;;  %v891_v50 = vmul.f32 %v883_v54, %v1988_v55  ;;  %v886_v56 = vpop.f32.mrf.mxu1 }
 0x392   : > { %v894_v58 = vmul.f32 %v886_v56, %v1988_v55 }
 0x393   : > { %897 = vst [vmem:[%s261_s30 + $0x10] sm:$0xff] %v891_v50 }
 0x394   : > { %900 = vst [vmem:[%s261_s30 + $0x28] sm:$0xff] %v894_v58 }
 0x395   : > { %1624 = shalt.err (!%p1621_p11)
}
 0x396   : > { %s1688_s29 = smov 384   ;;  %s1689_s24 = smov 24  }
 0x397   : > { %1070 = dma.vmem_to_hbm [thread:$0]  (%p1798_p7), %s915_s11, 768, %s917_s26, %s902_s19, %s1688_s29, %s1688_s29, %s1689_s24  }
 0x398 PF: > { %s931_s25 = sand.u32 1, %s1659_s15   ;;  %p2212_p12 = scmp.ge.s32.totalorder %s1671_s18, 2 }
 0x399   : > { %s932_s30 = scalar_lea.sflag [#allocation5], %s931_s25 }
 0x39a   : > { %p1087_p13 = pnand %p2212_p12, %p1750_p6 }
 0x39c   : > { %p1088_p0 = pneg %p1087_p13 }
 0x39e   : > { %1654 = dma.done.wait (%p1088_p0), %s932_s30, 768  }
 0x39f   : > { %1656 = vsyncadd (%p1088_p0), %s932_s30, 4294966528  ;;  %p19_p3 = scmp.ge.s32.totalorder %s1784_s23, 4   ;;  %s2213_s15 = smov %s1663_s16 }
 0x3a0   : > { %s2214_s16 = smov %s1667_s17  ;;  %s2215_s17 = smov %s1794_s27 }
 0x3a1   : > { %s2216_s18 = smov %s1784_s23  ;;  %21 = sbr.rel (!%p19_p3) target bundleno = 7 (0x7), region = 93 }
 0x3a6   :  { %938 = vsyncpa [#allocation4], 1 }
 0x3a7   :  { %940 = vsyncpa [#allocation4 + $0x1], 1 }
 0x3a8   :  { %941 = vsyncpa [#allocation7], 1 }
 0x3a9   :  { %942 = vsyncpa [#allocation10], 1 }
 0x3aa   :  { %943 = vsyncpa [#allocation5], 1 }
 0x3ab   :  { %945 = vsyncpa [#allocation5 + $0x1], 1 }

</bundles_post_ra>
